<compile_context>
chip_gen: v6e
topology: v6e:2x2x1
jax: 0.10.0
libtpu: 0.0.40
codegen_flags: <defaults>
</compile_context>

<pallas_src>
import numpy as np
import jax
import jax.numpy as jnp
from jax.experimental import pallas as pl
from jax.experimental.pallas import tpu as pltpu

_SPECIAL_CHARS = ['&', '@', '#', '(', ')', '-', '+', '=', '*', '%',
                  '.', ',', '\\', '/', '|', ':']
# Codepoints 40..47 ("()*+,-./") are all special; the remaining special chars
# (minus '@' and '%', which are re-used from features 3/4) are singletons.
_SPECIAL_SINGLES = (35, 38, 58, 61, 92, 124)      # '#', '&', ':', '=', '\\', '|'

_LANES = 128          # chars per vreg row (lane dimension)
_BLOCK_ROWS = 1024    # rows of 128 chars per grid step (sweepable)
_NFEAT = 8            # features per character (fixed by the reference module)


def _char_feature_kernel(codes_ref, out_ref):
    """codes_ref: [rows, 128] int32 codepoints
       out_ref:   [8, rows, 128] bf16 feature planes (feature-major)."""
    c = codes_ref[...]                                    # [rows, 128] int32

    # ASCII character-class predicates (match Python str methods for ASCII).
    is_lower = (c >= ord('a')) & (c <= ord('z'))
    is_upper = (c >= ord('A')) & (c <= ord('Z'))
    is_alpha = is_lower | is_upper
    is_digit = (c >= ord('0')) & (c <= ord('9'))
    # ' ', \t \n \v \f \r, and FS/GS/RS/US (0x1c..0x1f) — all isspace() in ASCII.
    is_space = (c == 32) | ((c >= 9) & (c <= 13)) | ((c >= 28) & (c <= 31))

    # Single-character predicates (reused for is_special where possible).
    eq_dot = c == ord('.')
    eq_at = c == ord('@')
    eq_pct = c == ord('%')
    eq_comma = c == ord(',')
    eq_zero = c == ord('0')
    eq_slash = c == ord('/')

    is_special = ((c >= 40) & (c <= 47)) | eq_at | eq_pct   # 40..47 = "()*+,-./"
    for sc in _SPECIAL_SINGLES:
        is_special = is_special | (c == sc)

    zero = jnp.zeros(c.shape, jnp.float32)

    # feature 0: 1/8 if lower else 2/8
    f0 = jnp.where(is_lower, 0.125, 0.25)
    # feature 1: space->1/8, alpha->2/8, numeric->3/8, special->4/8 (later wins)
    f1 = jnp.where(is_space, 0.125, zero)
    f1 = jnp.where(is_alpha, 0.25, f1)
    f1 = jnp.where(is_digit, 0.375, f1)
    f1 = jnp.where(is_special, 0.5, f1)
    # features 2..7: specific characters -> 2/8
    f2 = jnp.where(eq_dot, 0.25, zero)
    f3 = jnp.where(eq_at, 0.25, zero)
    f4 = jnp.where(eq_pct, 0.25, zero)
    f5 = jnp.where(eq_comma, 0.25, zero)
    f6 = jnp.where(eq_zero, 0.25, zero)
    f7 = jnp.where(eq_slash, 0.25, zero)

    dt = out_ref.dtype
    out_ref[0] = f0.astype(dt)
    out_ref[1] = f1.astype(dt)
    out_ref[2] = f2.astype(dt)
    out_ref[3] = f3.astype(dt)
    out_ref[4] = f4.astype(dt)
    out_ref[5] = f5.astype(dt)
    out_ref[6] = f6.astype(dt)
    out_ref[7] = f7.astype(dt)


def char_featurize_pallas(codes) -> jnp.ndarray:
    """codes: int array-like [N] of Unicode codepoints -> bf16 [N, 8] features
    (all values are k/8 with k in 0..4, exactly representable in bf16)."""
    codes = np.asarray(codes, dtype=np.int32).reshape(-1)
    n = int(codes.shape[0])
    if n == 0:
        return jnp.zeros((0, _NFEAT), jnp.bfloat16)

    rows = -(-n // _LANES)
    block_rows = min(_BLOCK_ROWS, ((rows + 7) // 8) * 8)     # 8-sublane aligned
    rows_pad = -(-rows // block_rows) * block_rows
    n_pad = rows_pad * _LANES

    # Host-side pad + reshape into the lane-dense tile layout: one H2D copy of
    # the (rows_pad, 128) buffer, no device-side pad pass.
    codes_p = np.zeros((rows_pad, _LANES), np.int32)
    codes_p.reshape(-1)[:n] = codes
    codes_dev = jnp.asarray(codes_p)

    out = pl.pallas_call(
        _char_feature_kernel,
        out_shape=jax.ShapeDtypeStruct((_NFEAT, rows_pad, _LANES), jnp.bfloat16),
        grid=(rows_pad // block_rows,),
        in_specs=[pl.BlockSpec((block_rows, _LANES), lambda i: (i, 0))],
        out_specs=pl.BlockSpec((_NFEAT, block_rows, _LANES), lambda i: (0, i, 0)),
        compiler_params=pltpu.CompilerParams(dimension_semantics=("parallel",)),
    )(codes_dev)

    # Layout plumbing back to the reference (total_chars, 8) layout — one fused
    # XLA transpose + slice (the kernel keeps full-lane, unmasked stores).
    feats = out.transpose(1, 2, 0).reshape(n_pad, _NFEAT)[:n]
    return feats


class CharFeaturizerPallas:
    """JAX/Pallas port of spade.featurizer.CharFeaturizer."""

    def __init__(self, d_hidden: int):
        self.d_hidden = d_hidden  # unused in forward (matches reference module)

    def forward(self, texts, bboxes):
        # Host-side glue: strings -> codepoints (vectorized), segment-id mask.
        codes_list = [
            np.frombuffer(text.encode("utf-32-le"), dtype="<u4").astype(np.int32)
            for text in texts
        ]
        lengths = np.array([len(t) for t in texts], dtype=np.int64)
        codes = (np.concatenate(codes_list) if codes_list
                 else np.zeros((0,), np.int32))
        features = char_featurize_pallas(codes)
        masks = jnp.asarray(np.repeat(np.arange(len(texts), dtype=np.int32), lengths))
        return dict(sequence_features=features, sequence_masks=masks)


# ----- pure-numpy reference (faithful re-implementation of the torch module) --
def _featurize_single_ref(text):
    seq_ft = []
    for char in text:
        ft = [0] * 8
        ft[0] = 1 if char.islower() else 2
        if char.isspace():
            ft[1] = 1
        if char.isalpha():
            ft[1] = 2
        if char.isnumeric():
            ft[1] = 3
        if char in _SPECIAL_CHARS:
            ft[1] = 4
        if char == '.':
            ft[2] = 2
        if char == '@':
            ft[3] = 2
        if char == '%':
            ft[4] = 2
        if char == ',':
            ft[5] = 2
        if char == '0':
            ft[6] = 2
        if char == '/':
            ft[7] = 2
        seq_ft.append(np.array(ft) / 8)
    return np.array(seq_ft)


if __name__ == "__main__":
    # Deterministic synthetic "texts": sample characters from a fixed alphabet
    # with jax.random.PRNGKey(0).
    alphabet = "abcdeXYZ 0129.@%,/\\&#:|()"
    key = jax.random.PRNGKey(0)
    k1, k2 = jax.random.split(key)
    idx1 = jax.random.randint(k1, (12,), 0, len(alphabet))
    idx2 = jax.random.randint(k2, (9,), 0, len(alphabet))
    texts = [
        "".join(alphabet[int(j)] for j in np.asarray(idx1)),
        "".join(alphabet[int(j)] for j in np.asarray(idx2)),
    ]
    bboxes = [None, None]  # unused by forward, kept for signature parity

    model = CharFeaturizerPallas(d_hidden=32)
    out = model.forward(texts, bboxes)
    feats = jax.block_until_ready(out["sequence_features"])
    masks = jax.block_until_ready(out["sequence_masks"])

    # Check against the reference semantics (bf16 is exact for all k/8 values).
    ref_feats = np.concatenate([_featurize_single_ref(t) for t in texts])
    ref_masks = np.array(sum(([i] * len(t) for i, t in enumerate(texts)), []))
    feats_np = np.asarray(feats).astype(np.float32)
    assert feats_np.shape == ref_feats.shape, (feats_np.shape, ref_feats.shape)
    np.testing.assert_allclose(feats_np, ref_feats, rtol=0, atol=1e-6)
    np.testing.assert_array_equal(np.asarray(masks), ref_masks)

    print("KERNEL_OK")
</pallas_src>

<mosaic_0001>
module attributes {stable_mosaic.version = 11 : i64} {
  func.func @_char_feature_kernel(%arg0: i32, %arg1: memref<8x128xi32, #tpu.memory_space<vmem>>, %arg2: memref<8x8x128xbf16, #tpu.memory_space<vmem>>) attributes {dimension_semantics = [#tpu.dimension_semantics<parallel>], iteration_bounds = array<i64: 1>, scalar_prefetch = 0 : i64, scratch_operands = 0 : i64, tpu.core_type = #tpu.core_type<tc>, window_params = [{transform_indices = @transform_0, window_bounds = array<i64: 8, 128>}, {transform_indices = @transform_1, window_bounds = array<i64: 8, 8, 128>}]} {
    %c0 = arith.constant 0 : index
    %c0_0 = arith.constant 0 : index
    %0 = vector.load %arg1[%c0, %c0_0] : memref<8x128xi32, #tpu.memory_space<vmem>>, vector<8x128xi32>
    %c97_i32 = arith.constant 97 : i32
    %1 = vector.broadcast %c97_i32 : i32 to vector<8x128xi32>
    %2 = arith.cmpi sge, %0, %1 : vector<8x128xi32>
    %c122_i32 = arith.constant 122 : i32
    %3 = vector.broadcast %c122_i32 : i32 to vector<8x128xi32>
    %4 = arith.cmpi sle, %0, %3 : vector<8x128xi32>
    %5 = arith.andi %2, %4 : vector<8x128xi1>
    %c65_i32 = arith.constant 65 : i32
    %6 = vector.broadcast %c65_i32 : i32 to vector<8x128xi32>
    %7 = arith.cmpi sge, %0, %6 : vector<8x128xi32>
    %c90_i32 = arith.constant 90 : i32
    %8 = vector.broadcast %c90_i32 : i32 to vector<8x128xi32>
    %9 = arith.cmpi sle, %0, %8 : vector<8x128xi32>
    %10 = arith.andi %7, %9 : vector<8x128xi1>
    %11 = arith.ori %5, %10 : vector<8x128xi1>
    %c48_i32 = arith.constant 48 : i32
    %12 = vector.broadcast %c48_i32 : i32 to vector<8x128xi32>
    %13 = arith.cmpi sge, %0, %12 : vector<8x128xi32>
    %c57_i32 = arith.constant 57 : i32
    %14 = vector.broadcast %c57_i32 : i32 to vector<8x128xi32>
    %15 = arith.cmpi sle, %0, %14 : vector<8x128xi32>
    %16 = arith.andi %13, %15 : vector<8x128xi1>
    %c32_i32 = arith.constant 32 : i32
    %17 = vector.broadcast %c32_i32 : i32 to vector<8x128xi32>
    %18 = arith.cmpi eq, %0, %17 : vector<8x128xi32>
    %c9_i32 = arith.constant 9 : i32
    %19 = vector.broadcast %c9_i32 : i32 to vector<8x128xi32>
    %20 = arith.cmpi sge, %0, %19 : vector<8x128xi32>
    %c13_i32 = arith.constant 13 : i32
    %21 = vector.broadcast %c13_i32 : i32 to vector<8x128xi32>
    %22 = arith.cmpi sle, %0, %21 : vector<8x128xi32>
    %23 = arith.andi %20, %22 : vector<8x128xi1>
    %24 = arith.ori %18, %23 : vector<8x128xi1>
    %c28_i32 = arith.constant 28 : i32
    %25 = vector.broadcast %c28_i32 : i32 to vector<8x128xi32>
    %26 = arith.cmpi sge, %0, %25 : vector<8x128xi32>
    %c31_i32 = arith.constant 31 : i32
    %27 = vector.broadcast %c31_i32 : i32 to vector<8x128xi32>
    %28 = arith.cmpi sle, %0, %27 : vector<8x128xi32>
    %29 = arith.andi %26, %28 : vector<8x128xi1>
    %30 = arith.ori %24, %29 : vector<8x128xi1>
    %c46_i32 = arith.constant 46 : i32
    %31 = vector.broadcast %c46_i32 : i32 to vector<8x128xi32>
    %32 = arith.cmpi eq, %0, %31 : vector<8x128xi32>
    %c64_i32 = arith.constant 64 : i32
    %33 = vector.broadcast %c64_i32 : i32 to vector<8x128xi32>
    %34 = arith.cmpi eq, %0, %33 : vector<8x128xi32>
    %c37_i32 = arith.constant 37 : i32
    %35 = vector.broadcast %c37_i32 : i32 to vector<8x128xi32>
    %36 = arith.cmpi eq, %0, %35 : vector<8x128xi32>
    %c44_i32 = arith.constant 44 : i32
    %37 = vector.broadcast %c44_i32 : i32 to vector<8x128xi32>
    %38 = arith.cmpi eq, %0, %37 : vector<8x128xi32>
    %c48_i32_1 = arith.constant 48 : i32
    %39 = vector.broadcast %c48_i32_1 : i32 to vector<8x128xi32>
    %40 = arith.cmpi eq, %0, %39 : vector<8x128xi32>
    %c47_i32 = arith.constant 47 : i32
    %41 = vector.broadcast %c47_i32 : i32 to vector<8x128xi32>
    %42 = arith.cmpi eq, %0, %41 : vector<8x128xi32>
    %c40_i32 = arith.constant 40 : i32
    %43 = vector.broadcast %c40_i32 : i32 to vector<8x128xi32>
    %44 = arith.cmpi sge, %0, %43 : vector<8x128xi32>
    %c47_i32_2 = arith.constant 47 : i32
    %45 = vector.broadcast %c47_i32_2 : i32 to vector<8x128xi32>
    %46 = arith.cmpi sle, %0, %45 : vector<8x128xi32>
    %47 = arith.andi %44, %46 : vector<8x128xi1>
    %48 = arith.ori %47, %34 : vector<8x128xi1>
    %49 = arith.ori %48, %36 : vector<8x128xi1>
    %c35_i32 = arith.constant 35 : i32
    %50 = vector.broadcast %c35_i32 : i32 to vector<8x128xi32>
    %51 = arith.cmpi eq, %0, %50 : vector<8x128xi32>
    %52 = arith.ori %49, %51 : vector<8x128xi1>
    %c38_i32 = arith.constant 38 : i32
    %53 = vector.broadcast %c38_i32 : i32 to vector<8x128xi32>
    %54 = arith.cmpi eq, %0, %53 : vector<8x128xi32>
    %55 = arith.ori %52, %54 : vector<8x128xi1>
    %c58_i32 = arith.constant 58 : i32
    %56 = vector.broadcast %c58_i32 : i32 to vector<8x128xi32>
    %57 = arith.cmpi eq, %0, %56 : vector<8x128xi32>
    %58 = arith.ori %55, %57 : vector<8x128xi1>
    %c61_i32 = arith.constant 61 : i32
    %59 = vector.broadcast %c61_i32 : i32 to vector<8x128xi32>
    %60 = arith.cmpi eq, %0, %59 : vector<8x128xi32>
    %61 = arith.ori %58, %60 : vector<8x128xi1>
    %c92_i32 = arith.constant 92 : i32
    %62 = vector.broadcast %c92_i32 : i32 to vector<8x128xi32>
    %63 = arith.cmpi eq, %0, %62 : vector<8x128xi32>
    %64 = arith.ori %61, %63 : vector<8x128xi1>
    %c124_i32 = arith.constant 124 : i32
    %65 = vector.broadcast %c124_i32 : i32 to vector<8x128xi32>
    %66 = arith.cmpi eq, %0, %65 : vector<8x128xi32>
    %67 = arith.ori %64, %66 : vector<8x128xi1>
    %cst = arith.constant 0.000000e+00 : f32
    %68 = vector.broadcast %cst : f32 to vector<8x128xf32>
    %cst_3 = arith.constant 1.250000e-01 : f32
    %cst_4 = arith.constant 2.500000e-01 : f32
    %69 = vector.broadcast %cst_3 : f32 to vector<8x128xf32>
    %70 = vector.broadcast %cst_4 : f32 to vector<8x128xf32>
    %71 = arith.select %5, %69, %70 : vector<8x128xi1>, vector<8x128xf32>
    %cst_5 = arith.constant 1.250000e-01 : f32
    %72 = vector.broadcast %cst_5 : f32 to vector<8x128xf32>
    %73 = arith.select %30, %72, %68 : vector<8x128xi1>, vector<8x128xf32>
    %cst_6 = arith.constant 2.500000e-01 : f32
    %74 = vector.broadcast %cst_6 : f32 to vector<8x128xf32>
    %75 = arith.select %11, %74, %73 : vector<8x128xi1>, vector<8x128xf32>
    %cst_7 = arith.constant 3.750000e-01 : f32
    %76 = vector.broadcast %cst_7 : f32 to vector<8x128xf32>
    %77 = arith.select %16, %76, %75 : vector<8x128xi1>, vector<8x128xf32>
    %cst_8 = arith.constant 5.000000e-01 : f32
    %78 = vector.broadcast %cst_8 : f32 to vector<8x128xf32>
    %79 = arith.select %67, %78, %77 : vector<8x128xi1>, vector<8x128xf32>
    %cst_9 = arith.constant 2.500000e-01 : f32
    %80 = vector.broadcast %cst_9 : f32 to vector<8x128xf32>
    %81 = arith.select %32, %80, %68 : vector<8x128xi1>, vector<8x128xf32>
    %cst_10 = arith.constant 2.500000e-01 : f32
    %82 = vector.broadcast %cst_10 : f32 to vector<8x128xf32>
    %83 = arith.select %34, %82, %68 : vector<8x128xi1>, vector<8x128xf32>
    %cst_11 = arith.constant 2.500000e-01 : f32
    %84 = vector.broadcast %cst_11 : f32 to vector<8x128xf32>
    %85 = arith.select %36, %84, %68 : vector<8x128xi1>, vector<8x128xf32>
    %cst_12 = arith.constant 2.500000e-01 : f32
    %86 = vector.broadcast %cst_12 : f32 to vector<8x128xf32>
    %87 = arith.select %38, %86, %68 : vector<8x128xi1>, vector<8x128xf32>
    %cst_13 = arith.constant 2.500000e-01 : f32
    %88 = vector.broadcast %cst_13 : f32 to vector<8x128xf32>
    %89 = arith.select %40, %88, %68 : vector<8x128xi1>, vector<8x128xf32>
    %cst_14 = arith.constant 2.500000e-01 : f32
    %90 = vector.broadcast %cst_14 : f32 to vector<8x128xf32>
    %91 = arith.select %42, %90, %68 : vector<8x128xi1>, vector<8x128xf32>
    %92 = arith.truncf %71 : vector<8x128xf32> to vector<8x128xbf16>
    %c0_15 = arith.constant 0 : index
    %c0_16 = arith.constant 0 : index
    %c0_17 = arith.constant 0 : index
    %93 = vector.load %arg2[%c0_15, %c0_16, %c0_17] : memref<8x8x128xbf16, #tpu.memory_space<vmem>>, vector<1x8x128xbf16>
    %94 = vector.shape_cast %93 : vector<1x8x128xbf16> to vector<8x128xbf16>
    %95 = vector.shape_cast %92 : vector<8x128xbf16> to vector<1x8x128xbf16>
    tpu.vector_store %arg2[%c0_15, %c0_16, %c0_17], %95 {strides = array<i32>} : memref<8x8x128xbf16, #tpu.memory_space<vmem>>, vector<1x8x128xbf16>,
    %96 = arith.truncf %79 : vector<8x128xf32> to vector<8x128xbf16>
    %c1 = arith.constant 1 : index
    %c0_18 = arith.constant 0 : index
    %c0_19 = arith.constant 0 : index
    %97 = vector.load %arg2[%c1, %c0_18, %c0_19] : memref<8x8x128xbf16, #tpu.memory_space<vmem>>, vector<1x8x128xbf16>
    %98 = vector.shape_cast %97 : vector<1x8x128xbf16> to vector<8x128xbf16>
    %99 = vector.shape_cast %96 : vector<8x128xbf16> to vector<1x8x128xbf16>
    tpu.vector_store %arg2[%c1, %c0_18, %c0_19], %99 {strides = array<i32>} : memref<8x8x128xbf16, #tpu.memory_space<vmem>>, vector<1x8x128xbf16>,
    %100 = arith.truncf %81 : vector<8x128xf32> to vector<8x128xbf16>
    %c2 = arith.constant 2 : index
    %c0_20 = arith.constant 0 : index
    %c0_21 = arith.constant 0 : index
    %101 = vector.load %arg2[%c2, %c0_20, %c0_21] : memref<8x8x128xbf16, #tpu.memory_space<vmem>>, vector<1x8x128xbf16>
    %102 = vector.shape_cast %101 : vector<1x8x128xbf16> to vector<8x128xbf16>
    %103 = vector.shape_cast %100 : vector<8x128xbf16> to vector<1x8x128xbf16>
    tpu.vector_store %arg2[%c2, %c0_20, %c0_21], %103 {strides = array<i32>} : memref<8x8x128xbf16, #tpu.memory_space<vmem>>, vector<1x8x128xbf16>,
    %104 = arith.truncf %83 : vector<8x128xf32> to vector<8x128xbf16>
    %c3 = arith.constant 3 : index
    %c0_22 = arith.constant 0 : index
    %c0_23 = arith.constant 0 : index
    %105 = vector.load %arg2[%c3, %c0_22, %c0_23] : memref<8x8x128xbf16, #tpu.memory_space<vmem>>, vector<1x8x128xbf16>
    %106 = vector.shape_cast %105 : vector<1x8x128xbf16> to vector<8x128xbf16>
    %107 = vector.shape_cast %104 : vector<8x128xbf16> to vector<1x8x128xbf16>
    tpu.vector_store %arg2[%c3, %c0_22, %c0_23], %107 {strides = array<i32>} : memref<8x8x128xbf16, #tpu.memory_space<vmem>>, vector<1x8x128xbf16>,
    %108 = arith.truncf %85 : vector<8x128xf32> to vector<8x128xbf16>
    %c4 = arith.constant 4 : index
    %c0_24 = arith.constant 0 : index
    %c0_25 = arith.constant 0 : index
    %109 = vector.load %arg2[%c4, %c0_24, %c0_25] : memref<8x8x128xbf16, #tpu.memory_space<vmem>>, vector<1x8x128xbf16>
    %110 = vector.shape_cast %109 : vector<1x8x128xbf16> to vector<8x128xbf16>
    %111 = vector.shape_cast %108 : vector<8x128xbf16> to vector<1x8x128xbf16>
    tpu.vector_store %arg2[%c4, %c0_24, %c0_25], %111 {strides = array<i32>} : memref<8x8x128xbf16, #tpu.memory_space<vmem>>, vector<1x8x128xbf16>,
    %112 = arith.truncf %87 : vector<8x128xf32> to vector<8x128xbf16>
    %c5 = arith.constant 5 : index
    %c0_26 = arith.constant 0 : index
    %c0_27 = arith.constant 0 : index
    %113 = vector.load %arg2[%c5, %c0_26, %c0_27] : memref<8x8x128xbf16, #tpu.memory_space<vmem>>, vector<1x8x128xbf16>
    %114 = vector.shape_cast %113 : vector<1x8x128xbf16> to vector<8x128xbf16>
    %115 = vector.shape_cast %112 : vector<8x128xbf16> to vector<1x8x128xbf16>
    tpu.vector_store %arg2[%c5, %c0_26, %c0_27], %115 {strides = array<i32>} : memref<8x8x128xbf16, #tpu.memory_space<vmem>>, vector<1x8x128xbf16>,
    %116 = arith.truncf %89 : vector<8x128xf32> to vector<8x128xbf16>
    %c6 = arith.constant 6 : index
    %c0_28 = arith.constant 0 : index
    %c0_29 = arith.constant 0 : index
    %117 = vector.load %arg2[%c6, %c0_28, %c0_29] : memref<8x8x128xbf16, #tpu.memory_space<vmem>>, vector<1x8x128xbf16>
    %118 = vector.shape_cast %117 : vector<1x8x128xbf16> to vector<8x128xbf16>
    %119 = vector.shape_cast %116 : vector<8x128xbf16> to vector<1x8x128xbf16>
    tpu.vector_store %arg2[%c6, %c0_28, %c0_29], %119 {strides = array<i32>} : memref<8x8x128xbf16, #tpu.memory_space<vmem>>, vector<1x8x128xbf16>,
    %120 = arith.truncf %91 : vector<8x128xf32> to vector<8x128xbf16>
    %c7 = arith.constant 7 : index
    %c0_30 = arith.constant 0 : index
    %c0_31 = arith.constant 0 : index
    %121 = vector.load %arg2[%c7, %c0_30, %c0_31] : memref<8x8x128xbf16, #tpu.memory_space<vmem>>, vector<1x8x128xbf16>
    %122 = vector.shape_cast %121 : vector<1x8x128xbf16> to vector<8x128xbf16>
    %123 = vector.shape_cast %120 : vector<8x128xbf16> to vector<1x8x128xbf16>
    tpu.vector_store %arg2[%c7, %c0_30, %c0_31], %123 {strides = array<i32>} : memref<8x8x128xbf16, #tpu.memory_space<vmem>>, vector<1x8x128xbf16>,
    return
  }
  func.func @transform_0(%arg0: i32) -> (i32, i32) {
    %c0_i32 = arith.constant 0 : i32
    %c0_i32_0 = arith.constant 0 : i32
    return %arg0, %c0_i32 : i32, i32
  }
  func.func @transform_1(%arg0: i32) -> (i32, i32, i32) {
    %c0_i32 = arith.constant 0 : i32
    %c0_i32_0 = arith.constant 0 : i32
    %c0_i32_1 = arith.constant 0 : i32
    return %c0_i32, %arg0, %c0_i32_0 : i32, i32, i32
  }
}

</mosaic_0001>

<bundles_post_ra>
// kernel: tpu_custom_call.1
= control target key start
LH: loop header
LB: loop body
LE: loop exit
PB: predicated region body
PF: predicated region fallthrough
CT: control target
= control target key end

     0   :  { %6 = vsyncpa [#allocation3], 0  ;;  %s238_s0 = inlined_call_operand.hbm [shape: s32[8,128], index: 0, kind: input, shape index: {}]   ;;  %s239_s1 = inlined_call_operand.hbm [shape: bf16[8,8,128], index: 1, kind: output, shape index: {}]  }
   0x1   :  { %7 = vsyncpa [#allocation4], 0  ;;  %s178_s6 = smov [#allocation2]  }
   0x2   :  { %s14_s7 = sshll.u32 %s178_s6, 4  ;;  %s15_s7 = int_to_ptr.vmem [resolvable:$true] %s14_s7 }
   0x3   :  { %s142_s8 = scalar_lea.vmem %s15_s7, 128  ;;  %p147_p1 = scmp.lt.s32.totalorder %s15_s7, %s15_s7 }
   0x4   :  { %p143_p0 = scmp.ne.s32.totalorder %s15_s7, %s142_s8  ;;  %p148_p2 = scmp.lt.s32.totalorder %s142_s8, %s142_s8 }
   0x6   :  { %p149_p3 = por %p148_p2, %p147_p1 }
   0x8   :  { %p150_p4 = pnand %p149_p3, %p143_p0 }
   0xa   :  { %153 = shalt.err (!%p150_p4)
}
   0xb   :  { %17 = dma.hbm_to_vmem [thread:$0]  %s238_s0, 128, %s15_s7, [#allocation3]  }
   0xc   :  { %174 = dma.done.wait [#allocation3], 128  }
   0xd   :  { %175 = vsyncadd [#allocation3], 4294967168  ;;  %v21_v0 = vld [vmem:[#allocation2] sm:$0xff]  ;;  %v244_v1 = vmov 0  ;;  %v246_v2 = vmov 0  ;;  %v248_v3 = vmov 0 }
   0xe   :  { %vm22_vm0 = vcmp.ge.s32.totalorder %v21_v0, 97  ;;  %vm23_vm1 = vcmp.le.s32.totalorder %v21_v0, 122  ;;  %vm25_vm2 = vcmp.ge.s32.totalorder %v21_v0, 65  ;;  %vm26_vm3 = vcmp.le.s32.totalorder %v21_v0, 90  ;;  %s181_s0 = smov [#allocation5]  }
   0xf   :  { %vm197_vm4 = vmand %vm22_vm0, %vm23_vm1  ;;  %vm29_vm5 = vcmp.ge.s32.totalorder %v21_v0, 48  ;;  %vm30_vm6 = vcmp.le.s32.totalorder %v21_v0, 57  ;;  %vm33_vm8 = vcmp.ge.s32.totalorder %v21_v0, 9  ;;  %vm34_vm9 = vcmp.le.s32.totalorder %v21_v0, 13  ;;  %s103_s11 = sshll.u32 %s181_s0, 4  ;;  %s104_s11 = int_to_ptr.vmem [resolvable:$true] %s103_s11 }
  0x10   :  { %v245_v1 = vsel %vm197_vm4, 4294967295, %v244_v1  ;;  %vm201_vm7 = vmand %vm25_vm2, %vm26_vm3  ;;  %vm32_vm11 = vcmp.eq.s32.totalorder %v21_v0, 32  ;;  %vm37_vm13 = vcmp.ge.s32.totalorder %v21_v0, 28  ;;  %vm38_vm14 = vcmp.le.s32.totalorder %v21_v0, 31  ;;  %s154_s12 = scalar_lea.vmem %s104_s11, 512  ;;  %p159_p6 = scmp.lt.s32.totalorder %s104_s11, %s104_s11 }
  0x11   :  { %v247_v2 = vsel %vm201_vm7, 4294967295, %v246_v2  ;;  %vm209_vm12 = vmand %vm29_vm5, %vm30_vm6  ;;  %vm42_vm15 = vcmp.eq.s32.totalorder %v21_v0, 64  ;;  %vm243_vm0 = vcmp.eq.s32.totalorder %v21_v0, 37  ;;  %vm47_vm2 = vcmp.ge.s32.totalorder %v21_v0, 40  ;;  %p155_p5 = scmp.ne.s32.totalorder %s104_s11, %s154_s12  ;;  %p160_p7 = scmp.lt.s32.totalorder %s154_s12, %s154_s12 }
  0x12   :  { %v249_v3 = vsel %vm209_vm12, 4294967295, %v248_v3  ;;  %vm35_vm1 = vmand %vm33_vm8, %vm34_vm9  ;;  %vm48_vm3 = vcmp.le.s32.totalorder %v21_v0, 47  ;;  %vm41_vm4 = vcmp.eq.s32.totalorder %v21_v0, 46  ;;  %v179_v4 = vmov 0.0  }
  0x13   :  { %v70_v5 = vsel %vm42_vm15, 0.25, %v179_v4  ;;  %vm214_vm7 = vmor %vm32_vm11, %vm35_vm1  ;;  %v69_v7 = vsel %vm41_vm4, 0.25, %v179_v4  ;;  %vm44_vm5 = vcmp.eq.s32.totalorder %v21_v0, 44  ;;  %v71_v8 = vsel %vm243_vm0, 0.25, %v179_v4  ;;  %p161_p8 = por %p160_p7, %p159_p6 }
  0x14   :  { %vm45_vm6 = vcmp.eq.s32.totalorder %v21_v0, 48  ;;  %vm39_vm10 = vmand %vm37_vm13, %vm38_vm14  ;;  %v120_v9 = vpack.c.bf16 %v70_v5, %v69_v7  ;;  %v72_v10 = vsel %vm44_vm5, 0.25, %v179_v4  ;;  %vm46_vm8 = vcmp.eq.s32.totalorder %v21_v0, 47 }
  0x15   :  { %v73_v11 = vsel %vm45_vm6, 0.25, %v179_v4  ;;  %vm40_vm9 = vmor %vm214_vm7, %vm39_vm10  ;;  %v123_v12 = vpack.c.bf16 %v72_v10, %v71_v8  ;;  %v74_v13 = vsel %vm46_vm8, 0.25, %v179_v4  ;;  %vm52_vm1 = vcmp.eq.s32.totalorder %v21_v0, 35  ;;  %p162_p9 = pnand %p161_p8, %p155_p5 }
  0x16   :  { %vm49_vm11 = vmand %vm47_vm2, %vm48_vm3  ;;  %v65_v14 = vsel %vm40_vm9, 0.125, %v179_v4  ;;  %121 = vst [vmem:[#allocation5 + $0x8] sm:$0xff] %v120_v9   ;;  %v126_v15 = vpack.c.bf16 %v74_v13, %v73_v11  ;;  %vm54_vm0 = vcmp.eq.s32.totalorder %v21_v0, 38  ;;  %vm252_vm13 = vcmp.eq.s32.totalorder %v21_v0, 37 }
  0x17   :  { %vm50_vm4 = vmor %vm49_vm11, %vm42_vm15  ;;  %124 = vst [vmem:[#allocation5 + $0x10] sm:$0xff] %v123_v12   ;;  %vm56_vm5 = vcmp.eq.s32.totalorder %v21_v0, 58  ;;  %vm58_vm12 = vcmp.eq.s32.totalorder %v21_v0, 61  ;;  %vm253_vm7 = vnez %v245_v1  ;;  %vm254_vm10 = vnez %v247_v2 }
  0x18   :  { %vm51_vm14 = vmor %vm50_vm4, %vm252_vm13  ;;  %127 = vst [vmem:[#allocation5 + $0x18] sm:$0xff] %v126_v15   ;;  %vm60_vm3 = vcmp.eq.s32.totalorder %v21_v0, 92  ;;  %vm62_vm11 = vcmp.eq.s32.totalorder %v21_v0, 124  ;;  %vm256_vm4 = vnez %v249_v3  ;;  %v180_v18 = vmov 0.25  }
  0x19   :  { %vm53_vm6 = vmor %vm51_vm14, %vm52_vm1  ;;  %v64_v19 = vsel %vm253_vm7, 0.125, %v180_v18 }
  0x1a   :  { %vm255_vm8 = vmor %vm253_vm7, %vm254_vm10 }
  0x1b   :  { %v66_v16 = vsel %vm255_vm8, 0.25, %v65_v14  ;;  %vm55_vm2 = vmor %vm53_vm6, %vm54_vm0 }
  0x1c   :  { %vm57_vm9 = vmor %vm55_vm2, %vm56_vm5  ;;  %v67_v17 = vsel %vm256_vm4, 0.375, %v66_v16 }
  0x1d   :  { %vm59_vm15 = vmor %vm57_vm9, %vm58_vm12 }
  0x1e   :  { %vm61_vm13 = vmor %vm59_vm15, %vm60_vm3 }
  0x1f   :  { %vm63_vm1 = vmor %vm61_vm13, %vm62_vm11 }
  0x20   :  { %v68_v20 = vsel %vm63_vm1, 0.5, %v67_v17 }
  0x21   :  { %v117_v21 = vpack.c.bf16 %v68_v20, %v64_v19 }
  0x23   :  { %118 = vst [vmem:[#allocation5] sm:$0xff] %v117_v21  }
  0x24   :  { %165 = shalt.err (!%p162_p9)
}
  0x25   :  { %s182_s13 = smov 64   ;;  %s183_s14 = smov 4  }
  0x26   :  { %109 = dma.vmem_to_hbm [thread:$0]  %s104_s11, 512, %s239_s1, [#allocation4], %s182_s13, %s182_s13, %s183_s14  }
  0x27   :  { %176 = dma.done.wait [#allocation4], 512  }
  0x28   :  { %177 = vsyncadd [#allocation4], 4294966784 }
  0x29   :  { %113 = vsyncpa [#allocation3], 1 }
  0x2a   :  { %114 = vsyncpa [#allocation4], 1 }

</bundles_post_ra>
